<compile_context>
chip_gen: v6e
topology: v6e:2x2x1
jax: 0.10.0
libtpu: 0.0.40
codegen_flags: <defaults>
</compile_context>

<pallas_src>
import jax
import jax.numpy as jnp
from jax.experimental import pallas as pl
from jax.experimental.pallas import tpu as pltpu


def _make_weighted_nll_kernel(tile_n, n_inner, n_rows):
    """Kernel accumulating sum_i w[t_i] * (-log_softmax(x_i)[t_i]) per outer group."""

    def kernel(x_ref, side_ref, out_ref):
        j = pl.program_id(1)

        @pl.when(j == 0)
        def _():
            out_ref[...] = jnp.zeros_like(out_ref)

        x = x_ref[...].astype(jnp.float32)            # (tile_n, C) logits (native dtype in HBM)
        side = side_ref[...]                          # (tile_n, 2) f32: [:,0]=weight, [:,1]=target
        wt = side[:, 0:1]                             # (tile_n, 1)
        tgt = side[:, 1:2].astype(jnp.int32)          # (tile_n, 1)

        # Numerically stable log-sum-exp along the class (lane) axis.
        m = jnp.max(x, axis=-1, keepdims=True)        # (tile_n, 1)
        z = x - m                                     # (tile_n, C)
        lse = jnp.log(jnp.sum(jnp.exp(z), axis=-1, keepdims=True))   # (tile_n, 1)

        # Gather the (shifted) target logit via a one-hot mask (no dynamic gather on vregs).
        col = jax.lax.broadcasted_iota(jnp.int32, x.shape, 1)
        z_t = jnp.sum(jnp.where(col == tgt, z, 0.0), axis=-1, keepdims=True)  # (tile_n, 1)

        # Explicit global-row validity mask: handles the ragged tail (OOB reads are
        # unspecified and may be inf/NaN) and fully-redundant over-coverage tiles.
        t_global = pl.program_id(0) * n_inner + j
        row0 = t_global * tile_n
        rows = jax.lax.broadcasted_iota(jnp.int32, (tile_n, 1), 0)
        valid = (row0 + rows) < n_rows

        contrib = jnp.where(valid, wt * (lse - z_t), 0.0)
        # Broadcast-add the tile's partial sum into the whole resident (8,128) block;
        # every element of block `o` ends up holding that group's partial sum.
        out_ref[...] += jnp.sum(contrib)

    return kernel


def weighted_focal_loss(output, target, w, focusing_param=2, tile_n=None):
    """output: (N, C) float logits (any float dtype); target: (N,) int ids; w: (C,) weights."""
    N, C = output.shape
    itemsize = jnp.dtype(output.dtype).itemsize

    # --- wrapper-side prep: per-row class weight + merged (weight, target) side input ---
    wf = w.astype(jnp.float32)
    wt = wf[target]                                   # (N,) per-row weight
    den = jnp.sum(wt)                                 # weighted-mean denominator
    side = jnp.stack([wt, target.astype(jnp.float32)], axis=-1)   # (N, 2) f32

    x = output
    n_rows = N
    if N < 8:                                         # tiny-batch corner: pad to one sublane tile
        pad = 8 - N
        x = jnp.pad(x, ((0, pad), (0, 0)))
        side = jnp.pad(side, ((0, pad), (0, 0)))
    n_arr = x.shape[0]

    # --- tile sizing: purely from a VMEM byte budget (no hard row cap) -------------------
    lanes_x = ((C + 127) // 128) * 128                # VMEM lane padding of the logits tile
    bytes_per_row = (2 * lanes_x * itemsize           # double-buffered native-dtype logits
                     + 2 * 128 * 4                    # double-buffered (tile_n,2) f32 side tile
                     + 3 * lanes_x * 4)               # in-kernel f32 temporaries (x, z, exp(z))
    if tile_n is None:
        budget_bytes = 24 * 1024 * 1024               # ~half of the 48 MiB scoped limit below
        tile_n = budget_bytes // bytes_per_row
    tile_n = max(8, min(16384, (int(tile_n) // 8) * 8))
    tile_n = min(tile_n, (n_arr // 8) * 8)            # keep the block within the array rows

    n_tiles = pl.cdiv(n_arr, tile_n)
    n_outer = 2 if n_tiles >= 2 else 1                # v7x: shard tile groups across both TCs
    n_inner = pl.cdiv(n_tiles, n_outer)
    last = n_tiles - 1

    def row_map(o, j):
        # Clamp so over-coverage tiles re-read a valid block (their rows are masked).
        return (jnp.minimum(o * n_inner + j, last), 0)

    kernel = _make_weighted_nll_kernel(tile_n, n_inner, n_rows)

    partials = pl.pallas_call(
        kernel,
        out_shape=jax.ShapeDtypeStruct((n_outer * 8, 128), jnp.float32),
        grid_spec=pltpu.PrefetchScalarGridSpec(
            num_scalar_prefetch=0,
            grid=(n_outer, n_inner),
            in_specs=[
                pl.BlockSpec((tile_n, C), row_map),   # logits tile (native dtype)
                pl.BlockSpec((tile_n, 2), row_map),   # merged (weight, target) tile
            ],
            out_specs=pl.BlockSpec((8, 128), lambda o, j: (o, 0)),  # per-group partial
        ),
        compiler_params=pltpu.CompilerParams(
            dimension_semantics=("parallel", "arbitrary"),
            vmem_limit_bytes=48 * 1024 * 1024,
        ),
    )(x, side)

    num = jnp.sum(partials[::8, 0])                   # one element per (8,128) group block

    # Final scalar math (weighted-mean CE -> focal) is trivial; do it in JAX.
    ce = num / den
    logpt = -ce
    pt = jnp.exp(logpt)
    return -((1.0 - pt) ** focusing_param) * logpt


def _reference(output, target, w, focusing_param=2):
    """Pure-JAX reference matching F.cross_entropy(weight=w) + focal wrapper."""
    logp = jax.nn.log_softmax(output.astype(jnp.float32), axis=-1)
    nll = -jnp.take_along_axis(logp, target[:, None], axis=-1)[:, 0]
    wt = w.astype(jnp.float32)[target]
    ce = jnp.sum(wt * nll) / jnp.sum(wt)
    logpt = -ce
    return -((1.0 - jnp.exp(logpt)) ** focusing_param) * logpt


if __name__ == "__main__":
    key = jax.random.PRNGKey(0)
    k1, k2, k3, k4, k5, k6 = jax.random.split(key, 6)

    # Case 1: module defaults (w = [1, 1]), N a multiple of the sublane tile.
    N, C = 16, 2
    output = jax.random.normal(k1, (N, C), dtype=jnp.float32)
    target = jax.random.randint(k2, (N,), 0, C, dtype=jnp.int32)
    w = jnp.array([1.0, 1.0], dtype=jnp.float32)
    loss = jax.block_until_ready(weighted_focal_loss(output, target, w, focusing_param=2))
    ref = _reference(output, target, w, focusing_param=2)
    assert jnp.allclose(loss, ref, atol=1e-5, rtol=1e-5), (loss, ref)

    # Case 2: ragged N (exercises in-kernel tail masking, no logits pad) + non-uniform weights.
    N2, C2 = 19, 2
    output2 = jax.random.normal(k3, (N2, C2), dtype=jnp.float32)
    target2 = jax.random.randint(k4, (N2,), 0, C2, dtype=jnp.int32)
    w2 = jnp.array([1.0, 2.0], dtype=jnp.float32)
    loss2 = jax.block_until_ready(weighted_focal_loss(output2, target2, w2, focusing_param=2))
    ref2 = _reference(output2, target2, w2, focusing_param=2)
    assert jnp.allclose(loss2, ref2, atol=1e-5, rtol=1e-5), (loss2, ref2)

    # Case 3: ragged N with multiple tiles + multiple row groups (parallel outer axis) and C=5.
    N3, C3 = 37, 5
    output3 = jax.random.normal(k5, (N3, C3), dtype=jnp.float32)
    target3 = jax.random.randint(k6, (N3,), 0, C3, dtype=jnp.int32)
    w3 = jnp.array([0.5, 1.0, 2.0, 1.5, 0.7], dtype=jnp.float32)
    loss3 = jax.block_until_ready(weighted_focal_loss(output3, target3, w3, focusing_param=2))
    ref3 = _reference(output3, target3, w3, focusing_param=2)
    assert jnp.allclose(loss3, ref3, atol=1e-5, rtol=1e-5), (loss3, ref3)

    print("KERNEL_OK")
</pallas_src>

<mosaic_0001>
module attributes {stable_mosaic.version = 11 : i64} {
  func.func @kernel(%arg0: i32, %arg1: i32, %arg2: memref<16x2xf32, #tpu.memory_space<vmem>>, %arg3: memref<16x2xf32, #tpu.memory_space<vmem>>, %arg4: memref<8x128xf32, #tpu.memory_space<vmem>>) attributes {dimension_semantics = [#tpu.dimension_semantics<parallel>, #tpu.dimension_semantics<arbitrary>], iteration_bounds = array<i64: 1, 1>, scalar_prefetch = 0 : i64, scratch_operands = 0 : i64, tpu.core_type = #tpu.core_type<tc>, window_params = [{transform_indices = @transform_0, window_bounds = array<i64: 16, 2>}, {transform_indices = @transform_1, window_bounds = array<i64: 16, 2>}, {transform_indices = @transform_2, window_bounds = array<i64: 8, 128>}]} {
    %c0_i32 = arith.constant 0 : i32
    %0 = arith.cmpi eq, %arg1, %c0_i32 : i32
    %1 = arith.extui %0 : i1 to i32
    %c0_i32_0 = arith.constant 0 : i32
    %2 = arith.cmpi ne, %1, %c0_i32_0 : i32
    scf.if %2 {
      %cst_14 = arith.constant 0.000000e+00 : f32
      %43 = vector.broadcast %cst_14 : f32 to vector<8x128xf32>
      %c0_15 = arith.constant 0 : index
      %c0_16 = arith.constant 0 : index
      %44 = vector.load %arg4[%c0_15, %c0_16] : memref<8x128xf32, #tpu.memory_space<vmem>>, vector<8x128xf32>
      tpu.vector_store %arg4[%c0_15, %c0_16], %43 {strides = array<i32>} : memref<8x128xf32, #tpu.memory_space<vmem>>, vector<8x128xf32>,
    } else {
    }
    %c0 = arith.constant 0 : index
    %c0_1 = arith.constant 0 : index
    %3 = vector.load %arg2[%c0, %c0_1] : memref<16x2xf32, #tpu.memory_space<vmem>>, vector<16x2xf32>
    %c0_2 = arith.constant 0 : index
    %c0_3 = arith.constant 0 : index
    %4 = vector.load %arg3[%c0_2, %c0_3] : memref<16x2xf32, #tpu.memory_space<vmem>>, vector<16x2xf32>
    %5 = vector.extract_strided_slice %4 {offsets = [0, 0], sizes = [16, 1], strides = [1, 1]} : vector<16x2xf32> to vector<16x1xf32>
    %6 = vector.extract_strided_slice %4 {offsets = [0, 1], sizes = [16, 1], strides = [1, 1]} : vector<16x2xf32> to vector<16x1xf32>
    %7 = arith.fptosi %6 : vector<16x1xf32> to vector<16x1xi32>
    %cst = arith.constant dense<0xFF800000> : vector<16xf32>
    %8 = vector.multi_reduction <maximumf>, %3, %cst [1] : vector<16x2xf32> to vector<16xf32>
    %9 = vector.shape_cast %8 : vector<16xf32> to vector<16x1xf32>
    %10 = vector.broadcast %9 : vector<16x1xf32> to vector<16x2xf32>
    %11 = arith.subf %3, %10 : vector<16x2xf32>
    %12 = math.exp %11 : vector<16x2xf32>
    %cst_4 = arith.constant dense<0.000000e+00> : vector<16xf32>
    %13 = vector.multi_reduction <add>, %12, %cst_4 [1] : vector<16x2xf32> to vector<16xf32>
    %14 = vector.shape_cast %13 : vector<16xf32> to vector<16x1xf32>
    %15 = math.log %14 : vector<16x1xf32>
    %16 = tpu.iota {dimensions = array<i32: 1>} : vector<16x2xi32>
    %17 = vector.broadcast %7 : vector<16x1xi32> to vector<16x2xi32>
    %18 = arith.cmpi eq, %16, %17 : vector<16x2xi32>
    %cst_5 = arith.constant 0.000000e+00 : f32
    %19 = vector.broadcast %cst_5 : f32 to vector<16x2xf32>
    %20 = arith.select %18, %11, %19 : vector<16x2xi1>, vector<16x2xf32>
    %cst_6 = arith.constant dense<0.000000e+00> : vector<16xf32>
    %21 = vector.multi_reduction <add>, %20, %cst_6 [1] : vector<16x2xf32> to vector<16xf32>
    %22 = vector.shape_cast %21 : vector<16xf32> to vector<16x1xf32>
    %c1_i32 = arith.constant 1 : i32
    %23 = arith.muli %arg0, %c1_i32 : i32
    %24 = arith.addi %23, %arg1 : i32
    %c16_i32 = arith.constant 16 : i32
    %25 = arith.muli %24, %c16_i32 : i32
    %26 = tpu.iota {dimensions = array<i32: 0>} : vector<16x1xi32>
    %27 = vector.broadcast %25 : i32 to vector<16x1xi32>
    %28 = arith.addi %27, %26 : vector<16x1xi32>
    %c16_i32_7 = arith.constant 16 : i32
    %29 = vector.broadcast %c16_i32_7 : i32 to vector<16x1xi32>
    %30 = arith.cmpi slt, %28, %29 : vector<16x1xi32>
    %31 = arith.subf %15, %22 : vector<16x1xf32>
    %32 = arith.mulf %5, %31 : vector<16x1xf32>
    %cst_8 = arith.constant 0.000000e+00 : f32
    %33 = vector.broadcast %cst_8 : f32 to vector<16x1xf32>
    %34 = arith.select %30, %32, %33 : vector<16x1xi1>, vector<16x1xf32>
    %c0_9 = arith.constant 0 : index
    %c0_10 = arith.constant 0 : index
    %35 = vector.load %arg4[%c0_9, %c0_10] : memref<8x128xf32, #tpu.memory_space<vmem>>, vector<8x128xf32>
    %36 = vector.shape_cast %34 : vector<16x1xf32> to vector<1x16x1xf32>
    %cst_11 = arith.constant dense<0.000000e+00> : vector<1xf32>
    %37 = vector.multi_reduction <add>, %36, %cst_11 [1, 2] : vector<1x16x1xf32> to vector<1xf32>
    %38 = vector.shape_cast %37 : vector<1xf32> to vector<1x1x1xf32>
    %39 = vector.extract %38[0, 0, 0] : f32 from vector<1x1x1xf32>
    %40 = vector.broadcast %39 : f32 to vector<8x128xf32>
    %41 = arith.addf %35, %40 : vector<8x128xf32>
    %c0_12 = arith.constant 0 : index
    %c0_13 = arith.constant 0 : index
    %42 = vector.load %arg4[%c0_12, %c0_13] : memref<8x128xf32, #tpu.memory_space<vmem>>, vector<8x128xf32>
    tpu.vector_store %arg4[%c0_12, %c0_13], %41 {strides = array<i32>} : memref<8x128xf32, #tpu.memory_space<vmem>>, vector<8x128xf32>,
    return
  }
  func.func @transform_0(%arg0: i32, %arg1: i32) -> (i32, i32) {
    %c1_i32 = arith.constant 1 : i32
    %0 = arith.muli %arg0, %c1_i32 : i32
    %1 = arith.addi %0, %arg1 : i32
    %c0_i32 = arith.constant 0 : i32
    %2 = arith.minsi %1, %c0_i32 : i32
    %c0_i32_0 = arith.constant 0 : i32
    %c0_i32_1 = arith.constant 0 : i32
    return %2, %c0_i32_0 : i32, i32
  }
  func.func @transform_1(%arg0: i32, %arg1: i32) -> (i32, i32) {
    %c1_i32 = arith.constant 1 : i32
    %0 = arith.muli %arg0, %c1_i32 : i32
    %1 = arith.addi %0, %arg1 : i32
    %c0_i32 = arith.constant 0 : i32
    %2 = arith.minsi %1, %c0_i32 : i32
    %c0_i32_0 = arith.constant 0 : i32
    %c0_i32_1 = arith.constant 0 : i32
    return %2, %c0_i32_0 : i32, i32
  }
  func.func @transform_2(%arg0: i32, %arg1: i32) -> (i32, i32) {
    %c0_i32 = arith.constant 0 : i32
    %c0_i32_0 = arith.constant 0 : i32
    return %arg0, %c0_i32 : i32, i32
  }
}

</mosaic_0001>

<bundles_post_ra>
// kernel: tpu_custom_call.1
= control target key start
LH: loop header
LB: loop body
LE: loop exit
PB: predicated region body
PF: predicated region fallthrough
CT: control target
= control target key end

     0   :  { %vm87_vm0 = vcmask 15360   ;;  %v228_v4 = vmov 1   ;;  %s266_s0 = inlined_call_operand.vmem [shape: f32[16,2], index: 0, kind: input, shape index: {}]   ;;  %s267_s1 = inlined_call_operand.vmem [shape: f32[16,2], index: 1, kind: input, shape index: {}]   ;;  %s268_s2 = inlined_call_operand.hbm [shape: f32[8,128], index: 2, kind: output, shape index: {}]  }
   0x1   :  { %v81_v0 = vld [vmem:[%s266_s0] sm:$0xff]  ;;  %v82_v1 = vld [vmem:[%s266_s0 + $0x8] sm:$0xff]  ;;  %196 = vset.pattern.permute.xlu1 %v228_v4  ;;  %197 = vset.pattern.permute.xlu0 %v228_v4 }
   0x2   :  { %v83_v2 = vld [vmem:[%s267_s1] sm:$0xff]  ;;  %v88_v3 = vsel %vm87_vm0, %v81_v0, -inf  ;;  %v84_v6 = vld [vmem:[%s267_s1 + $0x8] sm:$0xff] }
   0x3   :  { %v187_v5 = vtrunc.f32 %v83_v2 }
   0x4   :  { %7 = vsyncpa [#allocation3], 0  ;;  %89 = vmax.xlane.f32.xlu0 %v88_v3  ;;  %v189_v7 = vtrunc.f32 %v84_v6  ;;  %v91_v8 = vsel %vm87_vm0, %v82_v1, -inf  ;;  %v110_v17 = vlaneseq  ;;  %vm145_vm3 = vcmask 7168   ;;  %s229_s0 = smov [#allocation2]  }
   0x5   :  { %v188_v9 = vcvt.f32.s32 %v187_v5  ;;  %s167_s1 = sshll.u32 %s229_s0, 4  ;;  %s168_s1 = int_to_ptr.vmem [resolvable:$true] %s167_s1 }
   0x6   :  { %v190_v10 = vcvt.f32.s32 %v189_v7  ;;  %v111_v19 = vand.u32 127, %v110_v17  ;;  %s206_s18 = scalar_lea.vmem %s168_s1, 128  ;;  %p211_p1 = scmp.lt.s32.totalorder %s168_s1, %s168_s1 }
   0x7   :  { %113 = vperm.xlu1 %196, %v188_v9   ;;  %p207_p0 = scmp.ne.s32.totalorder %s168_s1, %s206_s18  ;;  %p212_p2 = scmp.lt.s32.totalorder %s206_s18, %s206_s18 }
   0x8   :  { %92 = vmax.xlane.f32.xlu0 %v91_v8 }
   0x9   :  { %p213_p3 = por %p212_p2, %p211_p1 }
   0xb   :  { %116 = vperm.xlu1 %196, %v190_v10   ;;  %p214_p4 = pnand %p213_p3, %p207_p0 }
  0x82   :  { %v114_v18 = vpop.permute.xlu1 %113 }
  0x83   :  { %vm118_vm1 = vcmp.eq.s32.totalorder %v111_v19, %v114_v18 }
  0x86   :  { %v117_v21 = vpop.permute.xlu1 %116 }
  0x87   :  { %vm119_vm2 = vcmp.eq.s32.totalorder %v111_v19, %v117_v21 }
  0x8d   :  { %v90_v11 = vpop.xlane.xlu0 %89 }
  0x8e   :  { %v94_v12 = vsub.f32 %v81_v0, %v90_v11 }
  0x90   :  { %v96_v13 = vmul.f32 1.442695, %v94_v12  ;;  %v120_v23 = vsel %vm118_vm1, %v94_v12, 0.0 }
  0x91   :  { %v93_v14 = vpop.xlane.xlu0 %92  ;;  %v122_v25 = vsel %vm87_vm0, %v120_v23, 0.0 }
  0x92   :  { %198 = vpow2.f32 %v96_v13  ;;  %v95_v15 = vsub.f32 %v82_v1, %v93_v14 }
  0x94   :  { %v98_v16 = vmul.f32 1.442695, %v95_v15  ;;  %v121_v27 = vsel %vm119_vm2, %v95_v15, 0.0 }
  0x95   :  { %v125_v28 = vsel %vm87_vm0, %v121_v27, 0.0 }
  0x96   :  { %200 = vpow2.f32 %v98_v16 }
  0x9f   :  { %v199_v20 = vpop.eup %198 }
  0xa0   :  { %v100_v22 = vsel %vm87_vm0, %v199_v20, 0.0 }
  0xa1   :  { %101 = vadd.xlane.f32.xlu0 %v100_v22 }
  0xa3   :  { %v201_v24 = vpop.eup %200 }
  0xa4   :  { %v103_v26 = vsel %vm87_vm0, %v201_v24, 0.0 }
  0xa5   :  { %123 = vadd.xlane.f32.xlu0 %v122_v25  ;;  %104 = vadd.xlane.f32.xlu1 %v103_v26 }
  0xa9   :  { %126 = vadd.xlane.f32.xlu0 %v125_v28 }
 0x12a   :  { %v102_v29 = vpop.xlane.xlu0 %101 }
 0x12b   :  { %202 = vlog2.f32 %v102_v29 }
 0x12e   :  { %v105_v30 = vpop.xlane.xlu1 %104  ;;  %v124_v32 = vpop.xlane.xlu0 %123 }
 0x12f   :  { %204 = vlog2.f32 %v105_v30 }
 0x132   :  { %v127_v37 = vpop.xlane.xlu0 %126 }
 0x138   :  { %v203_v31 = vpop.eup %202 }
 0x139   :  { %v107_v33 = vmul.f32 0.6931472, %v203_v31 }
 0x13b   :  { %v138_v34 = vsub.f32 %v107_v33, %v124_v32 }
 0x13c   :  { %v205_v35 = vpop.eup %204 }
 0x13d   :  { %v109_v36 = vmul.f32 0.6931472, %v205_v35  ;;  %v140_v38 = vmul.f32 %v138_v34, %v83_v2 }
 0x13f   :  { %v139_v39 = vsub.f32 %v109_v36, %v127_v37  ;;  %v146_v41 = vsel %vm145_vm3, %v140_v38, 0.0 }
 0x141   :  { %v141_v40 = vmul.f32 %v139_v39, %v84_v6 }
 0x143   :  { %v147_v42 = vsel %vm145_vm3, %v141_v40, 0.0 }
 0x144   :  { %v148_v43 = vadd.f32 %v147_v42, %v146_v41 }
 0x146   :  { %149 = vadd.xlane.f32.xlu0 %v148_v43 }
 0x1cf   :  { %v150_v44 = vpop.xlane.xlu0 %149 }
 0x1d0   :  { %v151_v45 = vrot.slane %v150_v44, 4 }
 0x1d2   :  { %v152_v46 = vadd.f32 %v151_v45, %v150_v44 }
 0x1d4   :  { %v153_v47 = vrot.slane %v152_v46, 2 }
 0x1d6   :  { %v154_v48 = vadd.f32 %v153_v47, %v152_v46 }
 0x1d8   :  { %v155_v49 = vrot.slane %v154_v48, 1 }
 0x1da   :  { %v156_v50 = vadd.f32 %v155_v49, %v154_v48 }
 0x1dc   :  { %191 = vpush %v156_v50 }
 0x20d   :  { %s192_s17 = spop %191 }
 0x20e   :  { %v158_v51 = vstv %s192_s17 }
 0x20f   :  { %160 = vst [vmem:[#allocation2] sm:$0xff] %v158_v51 }
 0x210   :  { %217 = shalt.err (!%p214_p4)
}
 0x211   :  { %170 = dma.vmem_to_hbm [thread:$0]  %s168_s1, 128, %s268_s2, [#allocation3]  }
 0x212   :  { %226 = dma.done.wait [#allocation3], 128  }
 0x213   :  { %227 = vsyncadd [#allocation3], 4294967168 }
 0x214   :  { %174 = vsyncpa [#allocation3], 1 }

</bundles_post_ra>
